<compile_context>
chip_gen: v7x
topology: tpu7x:2x2x1
jax: 0.10.0
libtpu: 0.0.40
codegen_flags: <defaults>
</compile_context>

<pallas_src>
import functools

import jax
import jax.numpy as jnp
from jax.experimental import pallas as pl
from jax.experimental.pallas import tpu as pltpu

MIN_SCALE_MC = 0.001
_DEFAULT_VMEM_LIMIT = 48 * 1024 * 1024  # above all scoped defaults, < v7x physical


def _softplus(x):
    # Numerically stable softplus (matches F.softplus to fp32 precision).
    return jnp.maximum(x, 0.0) + jnp.log1p(jnp.exp(-jnp.abs(x)))


def _round_up(x, m):
    return ((x + m - 1) // m) * m


def _fuse_params(wcov, bcov, wdiag, bdiag, wcls, bcls, compute_dtype):
    """Concatenate all projections into one lane-dense [F, (2+R)*C] weight."""
    F, C = wcls.shape
    R = 0 if wcov is None else wcov.shape[0]
    w_parts = [wcls, wdiag]
    b_parts = [bcls.reshape(1, C), bdiag.reshape(1, C)]
    if R > 0:
        # columns ordered r-major: [cls | diag | r=0 block | r=1 block | ...]
        w_parts.append(jnp.transpose(wcov, (1, 0, 2)).reshape(F, R * C))
        b_parts.append(bcov.reshape(1, R * C))
    w_all = jnp.concatenate(w_parts, axis=1).astype(compute_dtype)
    b_all = jnp.concatenate(b_parts, axis=1).astype(jnp.float32)
    return w_all, b_all, R, C


# ----------------------------------------------------------------------------
# Deterministic path (use_sampling=False):
#   logits = classifier(x) / T
#   vars   = (sum_r low_rank_cov[:, :, r]^2 + softplus(diag(x)) + eps) / T^2
# Output packed as [tb, 2*C] = [logits | vars].
# ----------------------------------------------------------------------------
def _det_kernel(x_ref, w_ref, b_ref, out_ref, *, num_classes, rank, inv_t, inv_t2):
    C, R = num_classes, rank
    # Single lane-dense fused matmul: [tb, F] @ [F, (2+R)*C], f32 accumulation.
    y = jnp.dot(x_ref[...], w_ref[...],
                preferred_element_type=jnp.float32) + b_ref[...]
    logits = y[:, :C]
    diag_var = _softplus(y[:, C:2 * C]) + MIN_SCALE_MC
    acc = diag_var
    for r in range(R):  # static unroll: cheap VPU square+add on lane slices
        lr_r = y[:, (2 + r) * C:(3 + r) * C]
        acc = acc + lr_r * lr_r
    out_ref[...] = jnp.concatenate([logits * inv_t, acc * inv_t2], axis=-1)


def het_head_deterministic(features, wcov, bcov, wdiag, bdiag, wcls, bcls, *,
                           temperature, tb=128, compute_dtype=jnp.float32,
                           vmem_limit_bytes=_DEFAULT_VMEM_LIMIT):
    B, F = features.shape
    w_all, b_all, R, C = _fuse_params(wcov, bcov, wdiag, bdiag, wcls, bcls,
                                      compute_dtype)
    Ntot = (2 + R) * C

    tb = min(tb, _round_up(B, 8))
    B_pad = _round_up(B, tb)
    x = features.astype(compute_dtype)
    if B_pad != B:
        x = jnp.pad(x, ((0, B_pad - B), (0, 0)))

    kernel = functools.partial(
        _det_kernel, num_classes=C, rank=R,
        inv_t=float(1.0 / temperature),
        inv_t2=float(1.0 / (temperature * temperature)))

    out = pl.pallas_call(
        kernel,
        out_shape=jax.ShapeDtypeStruct((B_pad, 2 * C), jnp.float32),
        grid_spec=pltpu.PrefetchScalarGridSpec(
            num_scalar_prefetch=0,
            grid=(B_pad // tb,),
            in_specs=[
                pl.BlockSpec((tb, F), lambda i: (i, 0)),        # features tile
                # TODO(synk): constant-index weight still gets default double
                # buffering; stage it once into scratch if VMEM-tight on v7x.
                pl.BlockSpec((F, Ntot), lambda i: (0, 0)),      # fused weight
                pl.BlockSpec((1, Ntot), lambda i: (0, 0)),      # fused bias
            ],
            out_specs=pl.BlockSpec((tb, 2 * C), lambda i: (i, 0))),
        compiler_params=pltpu.CompilerParams(
            dimension_semantics=("parallel",),
            vmem_limit_bytes=vmem_limit_bytes),
    )(x, w_all, b_all)
    return out[:B, :C], out[:B, C:]


# ----------------------------------------------------------------------------
# Sampling path (use_sampling=True):
#   samples = sqrt(diag_var)[:,None,:] * eps_diag
#           + einsum('bcr,bsr->bsc', low_rank_cov, eps_lr)
#   logits  = (classifier(x)[:,None,:] + samples) / T
# ----------------------------------------------------------------------------
def _sample_kernel(x_ref, w_ref, b_ref, eps_diag_ref, eps_lr_ref, out_ref, *,
                   num_classes, rank, inv_t):
    C, R = num_classes, rank
    y = jnp.dot(x_ref[...], w_ref[...],
                preferred_element_type=jnp.float32) + b_ref[...]
    # Fold 1/T into the small [tb, C] factors instead of a final pass over the
    # large [tb, S, C] block.
    cls_s = y[:, :C] * inv_t
    scale_s = jnp.sqrt(_softplus(y[:, C:2 * C]) + MIN_SCALE_MC) * inv_t
    # Accumulate directly into the output VMEM block (bounds vreg pressure).
    out_ref[...] = cls_s[:, None, :] + scale_s[:, None, :] * eps_diag_ref[...]
    eps_lr = eps_lr_ref[...]
    for r in range(R):  # rank-1 updates hoisted from the single fused matmul
        lr_r = y[:, (2 + r) * C:(3 + r) * C] * inv_t
        out_ref[...] += lr_r[:, None, :] * eps_lr[:, :, r:r + 1]


def het_head_sampling(features, wcov, bcov, wdiag, bdiag, wcls, bcls,
                      eps_diag, eps_lr, *, temperature, tb=128,
                      compute_dtype=jnp.float32,
                      vmem_limit_bytes=_DEFAULT_VMEM_LIMIT):
    B, F = features.shape
    S = eps_diag.shape[1]
    w_all, b_all, R, C = _fuse_params(wcov, bcov, wdiag, bdiag, wcls, bcls,
                                      compute_dtype)
    Ntot = (2 + R) * C
    R_in = max(R, 1)

    tb = min(tb, _round_up(B, 8))
    B_pad = _round_up(B, tb)
    x = features.astype(compute_dtype)
    ed = eps_diag.astype(jnp.float32)
    el = (eps_lr.astype(jnp.float32) if R > 0
          else jnp.zeros((B, S, 1), jnp.float32))
    if B_pad != B:
        pad = ((0, B_pad - B), (0, 0))
        x = jnp.pad(x, pad)
        ed = jnp.pad(ed, ((0, B_pad - B), (0, 0), (0, 0)))
        el = jnp.pad(el, ((0, B_pad - B), (0, 0), (0, 0)))

    kernel = functools.partial(
        _sample_kernel, num_classes=C, rank=R, inv_t=float(1.0 / temperature))

    out = pl.pallas_call(
        kernel,
        out_shape=jax.ShapeDtypeStruct((B_pad, S, C), jnp.float32),
        grid_spec=pltpu.PrefetchScalarGridSpec(
            num_scalar_prefetch=0,
            grid=(B_pad // tb,),
            in_specs=[
                pl.BlockSpec((tb, F), lambda i: (i, 0)),
                pl.BlockSpec((F, Ntot), lambda i: (0, 0)),
                pl.BlockSpec((1, Ntot), lambda i: (0, 0)),
                pl.BlockSpec((tb, S, C), lambda i: (i, 0, 0)),     # eps_diag
                pl.BlockSpec((tb, S, R_in), lambda i: (i, 0, 0)),  # eps_lr
            ],
            out_specs=pl.BlockSpec((tb, S, C), lambda i: (i, 0, 0))),
        compiler_params=pltpu.CompilerParams(
            dimension_semantics=("parallel",),
            vmem_limit_bytes=vmem_limit_bytes),
    )(x, w_all, b_all, ed, el)
    return out[:B]


# ----------------------------------------------------------------------------
# Pure-JAX reference (same parameter layout) for correctness checking.
# ----------------------------------------------------------------------------
def het_reference(features, wcov, bcov, wdiag, bdiag, wcls, bcls,
                  temperature, eps_diag=None, eps_lr=None):
    cls = features @ wcls + bcls
    diag_var = _softplus(features @ wdiag + bdiag) + MIN_SCALE_MC
    R = wcov.shape[0]
    lr = jnp.stack([features @ wcov[r] + bcov[r] for r in range(R)], axis=-1)
    if eps_diag is None:
        vars_ = jnp.sum(lr ** 2, axis=-1) + diag_var
        return cls / temperature, vars_ / temperature ** 2
    samples = (jnp.sqrt(diag_var)[:, None, :] * eps_diag
               + jnp.einsum('bcr,bsr->bsc', lr, eps_lr))
    return (cls[:, None, :] + samples) / temperature


if __name__ == "__main__":
    # Small, HETHead-consistent shapes.
    B, F, C, R, S = 16, 32, 16, 4, 8
    temperature = 1.5

    key = jax.random.PRNGKey(0)
    ks = jax.random.split(key, 10)
    bound = 1.0 / jnp.sqrt(jnp.float32(F))  # nn.Linear-style uniform init

    features = jax.random.normal(ks[0], (B, F), dtype=jnp.float32)
    wcov = jax.random.uniform(ks[1], (R, F, C), jnp.float32, -bound, bound)
    bcov = jax.random.uniform(ks[2], (R, C), jnp.float32, -bound, bound)
    wdiag = jax.random.uniform(ks[3], (F, C), jnp.float32, -bound, bound)
    bdiag = jax.random.uniform(ks[4], (1, C), jnp.float32, -bound, bound)
    wcls = jax.random.uniform(ks[5], (F, C), jnp.float32, -bound, bound)
    bcls = jax.random.uniform(ks[6], (1, C), jnp.float32, -bound, bound)
    eps_diag = jax.random.normal(ks[7], (B, S, C), dtype=jnp.float32)
    eps_lr = jax.random.normal(ks[8], (B, S, R), dtype=jnp.float32)

    # --- use_sampling = False, f32 compute ------------------------------------
    logits, vars_ = het_head_deterministic(
        features, wcov, bcov, wdiag, bdiag, wcls, bcls, temperature=temperature)
    jax.block_until_ready((logits, vars_))
    ref_logits, ref_vars = het_reference(
        features, wcov, bcov, wdiag, bdiag, wcls, bcls, temperature)
    assert jnp.allclose(logits, ref_logits, atol=1e-5, rtol=1e-5)
    assert jnp.allclose(vars_, ref_vars, atol=1e-5, rtol=1e-5)

    # --- use_sampling = True, f32 compute -------------------------------------
    mc_logits = het_head_sampling(
        features, wcov, bcov, wdiag, bdiag, wcls, bcls, eps_diag, eps_lr,
        temperature=temperature)
    jax.block_until_ready(mc_logits)
    ref_mc = het_reference(features, wcov, bcov, wdiag, bdiag, wcls, bcls,
                           temperature, eps_diag=eps_diag, eps_lr=eps_lr)
    assert jnp.allclose(mc_logits, ref_mc, atol=1e-5, rtol=1e-5)

    # --- padding path: B not a multiple of the batch tile ---------------------
    Bp = 10
    lp, vp = het_head_deterministic(
        features[:Bp], wcov, bcov, wdiag, bdiag, wcls, bcls,
        temperature=temperature)
    jax.block_until_ready((lp, vp))
    assert lp.shape == (Bp, C) and vp.shape == (Bp, C)
    assert jnp.allclose(lp, ref_logits[:Bp], atol=1e-5, rtol=1e-5)
    assert jnp.allclose(vp, ref_vars[:Bp], atol=1e-5, rtol=1e-5)

    # --- bf16 MXU inputs (f32 accumulation), looser tolerance ------------------
    lb, vb = het_head_deterministic(
        features, wcov, bcov, wdiag, bdiag, wcls, bcls,
        temperature=temperature, compute_dtype=jnp.bfloat16)
    mb = het_head_sampling(
        features, wcov, bcov, wdiag, bdiag, wcls, bcls, eps_diag, eps_lr,
        temperature=temperature, compute_dtype=jnp.bfloat16)
    jax.block_until_ready((lb, vb, mb))
    assert jnp.allclose(lb, ref_logits, atol=5e-2, rtol=5e-2)
    assert jnp.allclose(vb, ref_vars, atol=5e-2, rtol=5e-2)
    assert jnp.allclose(mb, ref_mc, atol=5e-2, rtol=5e-2)

    print("KERNEL_OK")
</pallas_src>

<mosaic_0001>
module attributes {stable_mosaic.version = 11 : i64} {
  func.func @_det_kernel(%arg0: i32, %arg1: memref<16x32xf32, #tpu.memory_space<vmem>>, %arg2: memref<32x96xf32, #tpu.memory_space<vmem>>, %arg3: memref<1x96xf32, #tpu.memory_space<vmem>>, %arg4: memref<16x32xf32, #tpu.memory_space<vmem>>) attributes {dimension_semantics = [#tpu.dimension_semantics<parallel>], iteration_bounds = array<i64: 1>, scalar_prefetch = 0 : i64, scratch_operands = 0 : i64, tpu.core_type = #tpu.core_type<tc>, window_params = [{transform_indices = @transform_0, window_bounds = array<i64: 16, 32>}, {pipeline_mode = #tpu.pipeline_mode<synchronous>, transform_indices = @transform_1, window_bounds = array<i64: 32, 96>}, {pipeline_mode = #tpu.pipeline_mode<synchronous>, transform_indices = @transform_2, window_bounds = array<i64: 1, 96>}, {transform_indices = @transform_3, window_bounds = array<i64: 16, 32>}]} {
    %c0 = arith.constant 0 : index
    %c0_0 = arith.constant 0 : index
    %0 = vector.load %arg1[%c0, %c0_0] : memref<16x32xf32, #tpu.memory_space<vmem>>, vector<16x32xf32>
    %c0_1 = arith.constant 0 : index
    %c0_2 = arith.constant 0 : index
    %1 = vector.load %arg2[%c0_1, %c0_2] : memref<32x96xf32, #tpu.memory_space<vmem>>, vector<32x96xf32>
    %cst = arith.constant dense<0.000000e+00> : vector<16x96xf32>
    %2 = tpu.matmul %0, %1, %cst {dimension_numbers = #tpu.dot_dimension_numbers<[1], [0], [0], [1], [0, 0, 1, 1], [], []>} : vector<16x32xf32>, vector<32x96xf32>, vector<16x96xf32> -> vector<16x96xf32>
    %c0_3 = arith.constant 0 : index
    %c0_4 = arith.constant 0 : index
    %3 = vector.load %arg3[%c0_3, %c0_4] : memref<1x96xf32, #tpu.memory_space<vmem>>, vector<1x96xf32>
    %4 = vector.broadcast %3 : vector<1x96xf32> to vector<16x96xf32>
    %5 = arith.addf %2, %4 : vector<16x96xf32>
    %6 = vector.extract_strided_slice %5 {offsets = [0, 0], sizes = [16, 16], strides = [1, 1]} : vector<16x96xf32> to vector<16x16xf32>
    %7 = vector.extract_strided_slice %5 {offsets = [0, 16], sizes = [16, 16], strides = [1, 1]} : vector<16x96xf32> to vector<16x16xf32>
    %cst_5 = arith.constant 0.000000e+00 : f32
    %8 = vector.broadcast %cst_5 : f32 to vector<16x16xf32>
    %9 = arith.maximumf %7, %8 : vector<16x16xf32>
    %10 = math.absf %7 : vector<16x16xf32>
    %cst_6 = arith.constant 0.000000e+00 : f32
    %11 = vector.broadcast %cst_6 : f32 to vector<16x16xf32>
    %12 = arith.subf %11, %10 : vector<16x16xf32>
    %13 = math.exp %12 : vector<16x16xf32>
    %14 = math.log1p %13 : vector<16x16xf32>
    %15 = arith.addf %9, %14 : vector<16x16xf32>
    %cst_7 = arith.constant 1.000000e-03 : f32
    %16 = vector.broadcast %cst_7 : f32 to vector<16x16xf32>
    %17 = arith.addf %15, %16 : vector<16x16xf32>
    %18 = vector.extract_strided_slice %5 {offsets = [0, 32], sizes = [16, 16], strides = [1, 1]} : vector<16x96xf32> to vector<16x16xf32>
    %19 = arith.mulf %18, %18 : vector<16x16xf32>
    %20 = arith.addf %17, %19 : vector<16x16xf32>
    %21 = vector.extract_strided_slice %5 {offsets = [0, 48], sizes = [16, 16], strides = [1, 1]} : vector<16x96xf32> to vector<16x16xf32>
    %22 = arith.mulf %21, %21 : vector<16x16xf32>
    %23 = arith.addf %20, %22 : vector<16x16xf32>
    %24 = vector.extract_strided_slice %5 {offsets = [0, 64], sizes = [16, 16], strides = [1, 1]} : vector<16x96xf32> to vector<16x16xf32>
    %25 = arith.mulf %24, %24 : vector<16x16xf32>
    %26 = arith.addf %23, %25 : vector<16x16xf32>
    %27 = vector.extract_strided_slice %5 {offsets = [0, 80], sizes = [16, 16], strides = [1, 1]} : vector<16x96xf32> to vector<16x16xf32>
    %28 = arith.mulf %27, %27 : vector<16x16xf32>
    %29 = arith.addf %26, %28 : vector<16x16xf32>
    %cst_8 = arith.constant 0.666666686 : f32
    %30 = vector.broadcast %cst_8 : f32 to vector<16x16xf32>
    %31 = arith.mulf %6, %30 : vector<16x16xf32>
    %cst_9 = arith.constant 0.444444448 : f32
    %32 = vector.broadcast %cst_9 : f32 to vector<16x16xf32>
    %33 = arith.mulf %29, %32 : vector<16x16xf32>
    %34 = tpu.concatenate %31, %33 in 1 : vector<16x16xf32>, vector<16x16xf32> -> vector<16x32xf32>
    %c0_10 = arith.constant 0 : index
    %c0_11 = arith.constant 0 : index
    %35 = vector.load %arg4[%c0_10, %c0_11] : memref<16x32xf32, #tpu.memory_space<vmem>>, vector<16x32xf32>
    tpu.vector_store %arg4[%c0_10, %c0_11], %34 {strides = array<i32>} : memref<16x32xf32, #tpu.memory_space<vmem>>, vector<16x32xf32>,
    return
  }
  func.func @transform_0(%arg0: i32) -> (i32, i32) {
    %c0_i32 = arith.constant 0 : i32
    %c0_i32_0 = arith.constant 0 : i32
    return %arg0, %c0_i32 : i32, i32
  }
  func.func @transform_1(%arg0: i32) -> (i32, i32) {
    %c0_i32 = arith.constant 0 : i32
    %c0_i32_0 = arith.constant 0 : i32
    %c0_i32_1 = arith.constant 0 : i32
    return %c0_i32, %c0_i32_0 : i32, i32
  }
  func.func @transform_2(%arg0: i32) -> (i32, i32) {
    %c0_i32 = arith.constant 0 : i32
    %c0_i32_0 = arith.constant 0 : i32
    %c0_i32_1 = arith.constant 0 : i32
    return %c0_i32, %c0_i32_0 : i32, i32
  }
  func.func @transform_3(%arg0: i32) -> (i32, i32) {
    %c0_i32 = arith.constant 0 : i32
    %c0_i32_0 = arith.constant 0 : i32
    return %arg0, %c0_i32 : i32, i32
  }
}

</mosaic_0001>

<bundles_post_ra>
// kernel: tpu_custom_call.1
= control target key start
LH: loop header
LB: loop body
LE: loop exit
PB: predicated region body
PF: predicated region fallthrough
CT: control target
= control target key end

     0   :  { %8 = vsyncpa [#allocation3], 0  ;;  %s445_s0 = inlined_call_operand.hbm [shape: f32[16,32], index: 0, kind: input, shape index: {}]   ;;  %s446_s1 = inlined_call_operand.hbm [shape: f32[32,96], index: 1, kind: input, shape index: {}]   ;;  %s447_s2 = inlined_call_operand.vmem [shape: f32[1,96], index: 2, kind: input, shape index: {}]   ;;  %s448_s3 = inlined_call_operand.hbm [shape: f32[16,32], index: 3, kind: output, shape index: {}]  }
   0x1   :  { %9 = vsyncpa [#allocation6], 0 }
   0x2   :  { %10 = vsyncpa [#allocation4], 0  ;;  %s350_s12 = smov [#allocation2]   ;;  %s278_s16 = scalar_lea.hbm %s445_s0, 256 }
   0x3   :  { %s16_s13 = sshll.u32 %s350_s12, 4  ;;  %p279_p0 = scmp.ne.s32.totalorder %s445_s0, %s278_s16  ;;  %s17_s13 = int_to_ptr.vmem [resolvable:$true] %s16_s13 }
   0x4   :  { %p282_p1 = scmp.lt.u32.totalorder %s278_s16, %s445_s0 }
   0x6   :  { %p284_p2 = pnand %p282_p1, %p279_p0 }
   0x8   :  { %287 = shalt.err (!%p284_p2)
}
   0x9   :  { %s288_s21 = scalar_lea.vmem %s17_s13, 256  ;;  %p293_p4 = scmp.lt.s32.totalorder %s17_s13, %s17_s13 }
   0xa   :  { %p289_p3 = scmp.ne.s32.totalorder %s17_s13, %s288_s21  ;;  %p294_p5 = scmp.lt.s32.totalorder %s288_s21, %s288_s21 }
   0xc   :  { %p295_p6 = por %p294_p5, %p293_p4 }
   0xe   :  { %p296_p7 = pnand %p295_p6, %p289_p3 }
  0x10   :  { %299 = shalt.err (!%p296_p7)
}
  0x11   :  { %s351_s22 = smov 128   ;;  %s352_s23 = smov 8  }
  0x12   :  { %22 = dma.hbm_to_vmem [thread:$0]  %s445_s0, 256, %s17_s13, [#allocation3], %s351_s22, %s351_s22, %s352_s23  }
  0x13   :  { %s353_s26 = smov [#allocation5]   ;;  %s300_s30 = scalar_lea.hbm %s446_s1, 512 }
  0x14   :  { %s28_s27 = sshll.u32 %s353_s26, 4  ;;  %p301_p8 = scmp.ne.s32.totalorder %s446_s1, %s300_s30  ;;  %s29_s27 = int_to_ptr.vmem [resolvable:$true] %s28_s27 }
  0x15   :  { %p304_p9 = scmp.lt.u32.totalorder %s300_s30, %s446_s1 }
  0x17   :  { %p306_p10 = pnand %p304_p9, %p301_p8 }
  0x19   :  { %309 = shalt.err (!%p306_p10)
}
  0x1a   :  { %s310_s8 = scalar_lea.vmem %s29_s27, 512  ;;  %p315_p12 = scmp.lt.s32.totalorder %s29_s27, %s29_s27 }
  0x1b   :  { %p311_p11 = scmp.ne.s32.totalorder %s29_s27, %s310_s8  ;;  %p316_p13 = scmp.lt.s32.totalorder %s310_s8, %s310_s8 }
  0x1d   :  { %p317_p0 = por %p316_p13, %p315_p12 }
  0x1f   :  { %p318_p1 = pnand %p317_p0, %p311_p11 }
  0x21   :  { %321 = shalt.err (!%p318_p1)
}
  0x22   :  { %34 = dma.hbm_to_vmem [thread:$0]  %s446_s1, 512, %s29_s27, [#allocation6], %s351_s22, %s351_s22, %s352_s23  }
  0x23   :  { %344 = dma.done.wait [#allocation3], 256  }
  0x24   :  { %345 = vsyncadd [#allocation3], 4294967040 }
  0x25   :  { %346 = dma.done.wait [#allocation6], 512  }
  0x26   :  { %347 = vsyncadd [#allocation6], 4294966784  ;;  %vm56_vm0 = vcmask 261120   ;;  %v45_v0 = vld [vmem:[#allocation5] sm:$0xff]  ;;  %v46_v1 = vld [vmem:[#allocation5 + $0x8] sm:$0xff]  ;;  %s354_s11 = smov 96  }
  0x27   :  { %v47_v2 = vld [vmem:[#allocation5 + $0x10] sm:$0xff]  ;;  %v253_v3 = vpack.c.bf16 %v46_v1, %v45_v0  ;;  %v48_v4 = vld [vmem:[#allocation5 + $0x18] sm:$0xff]  ;;  %s355_s12 = smov 112   ;;  %s356_s13 = smov 80   ;;  %vm210_vm3 = vcmask 130048  }
  0x28   :  { %v43_v5 = vld [vmem:[#allocation2] sm:$0xff]  ;;  %v257_v6 = vpack.c.bf16 %v48_v4, %v47_v2  ;;  %v44_v7 = vld [vmem:[#allocation2 + $0x8] sm:$0xff]  ;;  %s358_s14 = smov [#allocation7]  }
  0x29   :  { %250 = vmatprep.mubr.msk.f32.mxu0 %vm56_vm0, %v43_v5  ;;  %254 = vmatprep.subr.bf16.mxu0 %v253_v3  ;;  %v233_v8 = vld [vmem:[%s447_s2] ss:$0 sm:$0xff]  ;;  %s357_s2 = smov 64   ;;  %s220_s15 = sshll.u32 %s358_s14, 4  ;;  %s221_s15 = int_to_ptr.vmem [resolvable:$true] %s220_s15 }
  0x2a   :  { %256 = vmatpush3.bf16.msra.mxu0 %v253_v3  ;;  %s322_s16 = scalar_lea.vmem %s221_s15, 256  ;;  %p327_p3 = scmp.lt.s32.totalorder %s221_s15, %s221_s15 }
  0x2b   :  { %258 = vmatprep.subr.bf16.mxu0 %v257_v6  ;;  %p323_p2 = scmp.ne.s32.totalorder %s221_s15, %s322_s16  ;;  %p328_p4 = scmp.lt.s32.totalorder %s322_s16, %s322_s16 }
  0x2d   :  { %p329_p5 = por %p328_p4, %p327_p3 }
  0x2e   :  { %260 = vmatpush3.bf16.msra.mxu0 %v257_v6 }
  0x2f   :  { %p330_p6 = pnand %p329_p5, %p323_p2 }
  0x31   :  { %251 = vmatmul.mubr.msk.f32.vlgmr.msra.gmra.mrb[0].mxu0 %vm56_vm0, %v44_v7 }
 0x104   :  { %v252_v9 = vpop.f32.mrb[0].mxu0 }
 0x105   :  { %v414_v10 = vadd.f32 %v252_v9, %v233_v8  ;;  %v129_v11 = vpop.f32.mrb[1].mxu0 }
 0x106   :  { %v416_v12 = vadd.f32 %v233_v8, %v129_v11 }
 0x107   :  { %v171_v13 = vmul.f32 %v414_v10, %v414_v10  ;;  %v141_v15 = vand.u32 2147483647, %v414_v10  ;;  %v139_v37 = vmax.f32 %v414_v10, 0.0  ;;  %v207_v61 = vmul.f32 0.6666667, %v414_v10 }
 0x108   :  { %v170_v14 = vmul.f32 %v416_v12, %v416_v12  ;;  %v140_v17 = vand.u32 2147483647, %v416_v12  ;;  %v138_v41 = vmax.f32 %v416_v12, 0.0  ;;  %v206_v62 = vmul.f32 0.6666667, %v416_v12 }
 0x109   :  { %184 = vrot.lane.b32.xlu1 %v171_v13, %s354_s11  ;;  %176 = vrot.lane.b32.xlu0 %v171_v13, %s355_s12  ;;  %v143_v16 = vsub.f32 0.0, %v141_v15 }
 0x10a   :  { %v142_v19 = vsub.f32 0.0, %v140_v17 }
 0x10b   :  { %v146_v18 = vmul.f32 1.442695, %v143_v16 }
 0x10c   :  { %v144_v20 = vmul.f32 1.442695, %v142_v19 }
 0x10d   :  { %192 = vrot.lane.b32.xlu1 %v171_v13, %s356_s13  ;;  %174 = vrot.lane.b32.xlu0 %v170_v14, %s355_s12  ;;  %270 = vpow2.f32 %v146_v18 }
 0x10e   :  { %272 = vpow2.f32 %v144_v20 }
 0x111   :  { %182 = vrot.lane.b32.xlu1 %v170_v14, %s354_s11  ;;  %190 = vrot.lane.b32.xlu0 %v170_v14, %s356_s13 }
 0x115   :  { %200 = vrot.lane.b32.xlu1 %v171_v13, %s357_s2  ;;  %198 = vrot.lane.b32.xlu0 %v170_v14, %s357_s2 }
 0x117   :  { %v271_v21 = vpop.eup %270 }
 0x118   :  { %v157_v22 = vadd.f32 1.0, %v271_v21  ;;  %v273_v23 = vpop.eup %272  ;;  %v160_v25 = vmul.f32 -0.5, %v271_v21  ;;  %v163_v29 = vand.u32 2147483647, %v271_v21 }
 0x119   :  { %v148_v24 = vadd.f32 1.0, %v273_v23  ;;  %v151_v28 = vmul.f32 -0.5, %v273_v23  ;;  %v154_v34 = vand.u32 2147483647, %v273_v23 }
 0x11a   :  { %274 = vlog2.f32 %v157_v22  ;;  %v161_v27 = vadd.f32 1.0, %v160_v25  ;;  %vm164_vm1 = vcmp.lt.f32.partialorder %v163_v29, 0.0004427343 }
 0x11b   :  { %276 = vlog2.f32 %v148_v24  ;;  %v152_v33 = vadd.f32 1.0, %v151_v28  ;;  %vm155_vm2 = vcmp.lt.f32.partialorder %v154_v34, 0.0004427343 }
 0x11c   :  { %v162_v32 = vmul.f32 %v271_v21, %v161_v27 }
 0x11d   :  { %v153_v38 = vmul.f32 %v273_v23, %v152_v33 }
 0x124   :  { %v275_v26 = vpop.eup %274 }
 0x125   :  { %v159_v30 = vmul.f32 0.6931472, %v275_v26  ;;  %v277_v31 = vpop.eup %276 }
 0x126   :  { %v150_v36 = vmul.f32 0.6931472, %v277_v31 }
 0x127   :  { %v165_v35 = vsel %vm164_vm1, %v162_v32, %v159_v30 }
 0x128   :  { %v167_v39 = vadd.f32 %v165_v35, %v139_v37  ;;  %v156_v40 = vsel %vm155_vm2, %v153_v38, %v150_v36 }
 0x129   :  { %v166_v45 = vadd.f32 %v156_v40, %v138_v41 }
 0x12a   :  { %v169_v44 = vadd.f32 0.001, %v167_v39 }
 0x12b   :  { %v168_v49 = vadd.f32 0.001, %v166_v45 }
 0x17b   :  { %v185_v42 = vpop.permute.xlu1 %184  ;;  %v177_v43 = vpop.permute.xlu0 %176 }
 0x17c   :  { %v181_v46 = vadd.f32 %v177_v43, %v169_v44 }
 0x17e   :  { %v189_v50 = vadd.f32 %v185_v42, %v181_v46 }
 0x17f   :  { %v193_v47 = vpop.permute.xlu1 %192  ;;  %v175_v48 = vpop.permute.xlu0 %174 }
 0x180   :  { %v180_v51 = vadd.f32 %v175_v48, %v168_v49  ;;  %v197_v55 = vadd.f32 %v193_v47, %v189_v50 }
 0x183   :  { %v183_v52 = vpop.permute.xlu1 %182  ;;  %v191_v53 = vpop.permute.xlu0 %190 }
 0x184   :  { %v188_v54 = vadd.f32 %v183_v52, %v180_v51 }
 0x186   :  { %v196_v56 = vadd.f32 %v191_v53, %v188_v54 }
 0x187   :  { %v201_v57 = vpop.permute.xlu1 %200  ;;  %v199_v58 = vpop.permute.xlu0 %198 }
 0x188   :  { %v205_v59 = vadd.f32 %v201_v57, %v197_v55  ;;  %v204_v60 = vadd.f32 %v199_v58, %v196_v56 }
 0x18a   :  { %v209_v63 = vmul.f32 0.44444445, %v205_v59  ;;  %v208_v0 = vmul.f32 0.44444445, %v204_v60 }
 0x18c   :  { %v212_v1 = vsel %vm210_vm3, %v207_v61, %v209_v63  ;;  %v211_v2 = vsel %vm210_vm3, %v206_v62, %v208_v0 }
 0x18d   :  { %214 = vst.msk [vmem:[#allocation7 + $0x8] sm:$0xff] %vm56_vm0, %v212_v1  ;;  %213 = vst.msk [vmem:[#allocation7] sm:$0xff] %vm56_vm0, %v211_v2 }
 0x18e   :  { %333 = shalt.err (!%p330_p6)
}
 0x18f   :  { %s334_s19 = scalar_lea.hbm %s448_s3, 256 }
 0x190   :  { %p335_p7 = scmp.ne.s32.totalorder %s448_s3, %s334_s19  ;;  %p338_p8 = scmp.lt.u32.totalorder %s334_s19, %s448_s3 }
 0x192   :  { %p340_p9 = pnand %p338_p8, %p335_p7 }
 0x194   :  { %343 = shalt.err (!%p340_p9)
}
 0x195   :  { %226 = dma.vmem_to_hbm [thread:$0]  %s221_s15, 256, %s448_s3, [#allocation4], %s351_s22, %s351_s22, %s352_s23  }
 0x196   :  { %348 = dma.done.wait [#allocation4], 256  }
 0x197   :  { %349 = vsyncadd [#allocation4], 4294967040 }
 0x198   :  { %230 = vsyncpa [#allocation3], 1 }
 0x199   :  { %231 = vsyncpa [#allocation6], 1 }
 0x19a   :  { %232 = vsyncpa [#allocation4], 1 }

</bundles_post_ra>
